<compile_context>
chip_gen: v5e
topology: v5e:2x2
jax: 0.10.0
libtpu: 0.0.40
codegen_flags: <defaults>
</compile_context>

<pallas_src>
import jax
import jax.numpy as jnp
from jax import lax
from jax.experimental import pallas as pl
from jax.experimental.pallas import tpu as pltpu


def _round_up(x, m):
    return ((x + m - 1) // m) * m


def _discriminator_kernel(emb_ref, pos_ref, w1a_ref, w1b_ref, b1_ref,
                          w2_ref, b2_ref, o_ref):
    # emb_ref: [TB, d_e]      pos_ref: [TB, d_p]
    # w1a_ref: [d_e, hidden]  w1b_ref: [d_p, hidden]   b1_ref: [1, hidden]
    # w2_ref:  [1, hidden]    b2_ref:  [1, 1]
    # o_ref:   [1, TB]   (lane-dense: lane j = output for row j of this tile)
    h = (jnp.dot(emb_ref[...], w1a_ref[...], preferred_element_type=jnp.float32)
         + jnp.dot(pos_ref[...], w1b_ref[...], preferred_element_type=jnp.float32)
         + b1_ref[...])
    h = jnp.maximum(h, 0.0)                                   # ReLU (f32)
    # Second layer: contract over hidden with batch rows landing on lanes
    # (same dot_general pattern as attention scores q @ k^T -> no vxpose).
    out_row = lax.dot_general(
        w2_ref[...], h,
        dimension_numbers=(((1,), (1,)), ((), ())),
        preferred_element_type=jnp.float32)                   # [1, TB]
    o_ref[...] = (out_row + b2_ref[...]).astype(o_ref.dtype)


def _choose_row_tile(B, d_e, d_p, hidden, act_itemsize, w_itemsize, block_rows):
    """VMEM-aware row-tile size + vmem_limit_bytes (per-generation)."""
    def lane(n):
        return _round_up(n, 128)

    def sub(n):
        return _round_up(n, 8)

    try:
        vmem_cap = int(pltpu.get_tpu_info().vmem_capacity_bytes)
    except Exception:
        vmem_cap = 64 * 1024 * 1024       # assume v7x (smallest per-core VMEM)

    # Byte budget with lane/sublane padding.  Weights & biases use constant
    # index maps but still get 2-deep pipeline buffers, so count them twice.
    fixed = 2 * (sub(d_e) + sub(d_p)) * lane(hidden) * w_itemsize      # w1a, w1b
    fixed += 2 * 2 * sub(1) * lane(hidden) * 4                          # b1, w2
    fixed += 2 * sub(1) * lane(1) * 4                                   # b2
    per_row = 2 * (lane(d_e) + lane(d_p)) * act_itemsize                # x tiles (2 bufs)
    per_row += 2 * lane(hidden) * 4                                     # f32 h (+ temp headroom)
    per_row += 2 * sub(1) * 4                                           # output row (2 bufs)

    budget = int(vmem_cap * 0.55)
    tb_vmem = max((budget - fixed) // per_row, 128)

    if B <= 128:
        tb = B                               # single, exact (non-ragged) tile
    else:
        tb = min(block_rows, tb_vmem)
        # Keep >= ~4 row tiles when B is big enough: both v7x TensorCores get
        # work along the "parallel" axis and DMA/compute overlap is possible.
        tb = min(tb, _round_up(pl.cdiv(B, 4), 128))
        # Multiple of 128 => lane-dense (unmasked) output stores and
        # (8,128)-legal activation blocks.  Last grid step may be ragged.
        tb = _round_up(min(tb, B), 128)

    vmem_needed = fixed + per_row * tb
    vmem_limit = int(min(0.9 * vmem_cap,
                         max(1.5 * vmem_needed, 32 * 1024 * 1024)))
    return tb, vmem_limit


def discriminator_forward(embeddings, positive, params, *, block_rows=4096,
                          cast_to_bf16=True):
    """embeddings: [..., d_e], positive: [..., d_p]; returns [..., 1]."""
    w1a, w1b = params["w1a"], params["w1b"]
    b1, w2, b2 = params["b1"], params["w2"], params["b2"]

    d_e = embeddings.shape[-1]
    d_p = positive.shape[-1]
    hidden = w1a.shape[1]
    lead_shape = embeddings.shape[:-1]
    out_dtype = jnp.result_type(embeddings.dtype, w1a.dtype, jnp.float32)

    emb2d = embeddings.reshape((-1, d_e))
    pos2d = positive.reshape((-1, d_p))
    B = emb2d.shape[0]
    if B == 0:
        return jnp.zeros(lead_shape + (1,), out_dtype)

    if cast_to_bf16:
        # Halve HBM traffic of the bandwidth-bound activation/weight reads;
        # accumulation stays f32 inside the kernel (preferred_element_type).
        emb2d = emb2d.astype(jnp.bfloat16)
        pos2d = pos2d.astype(jnp.bfloat16)
        w1a = w1a.astype(jnp.bfloat16)
        w1b = w1b.astype(jnp.bfloat16)

    act_isz = jnp.dtype(emb2d.dtype).itemsize
    w_isz = jnp.dtype(w1a.dtype).itemsize
    out_isz = jnp.dtype(out_dtype).itemsize

    tb, vmem_limit = _choose_row_tile(B, d_e, d_p, hidden, act_isz, w_isz,
                                      block_rows)
    num_tiles = pl.cdiv(B, tb)

    cost = pl.CostEstimate(
        flops=2 * B * (d_e + d_p + 1) * hidden,
        transcendentals=0,
        bytes_accessed=int(B * (d_e + d_p) * act_isz
                           + (d_e + d_p + 2) * hidden * w_isz
                           + num_tiles * tb * out_isz),
    )

    out = pl.pallas_call(
        _discriminator_kernel,
        out_shape=jax.ShapeDtypeStruct((num_tiles, tb), out_dtype),
        grid_spec=pltpu.PrefetchScalarGridSpec(
            num_scalar_prefetch=0,
            grid=(num_tiles,),
            in_specs=[
                pl.BlockSpec((tb, d_e), lambda i: (i, 0)),       # embeddings tile
                pl.BlockSpec((tb, d_p), lambda i: (i, 0)),       # positive tile
                pl.BlockSpec((d_e, hidden), lambda i: (0, 0)),   # W1^T rows for emb
                pl.BlockSpec((d_p, hidden), lambda i: (0, 0)),   # W1^T rows for pos
                pl.BlockSpec((1, hidden), lambda i: (0, 0)),     # b1
                pl.BlockSpec((1, hidden), lambda i: (0, 0)),     # w2 (row)
                pl.BlockSpec((1, 1), lambda i: (0, 0)),          # b2
            ],
            out_specs=pl.BlockSpec((1, tb), lambda i: (i, 0)),
        ),
        compiler_params=pltpu.CompilerParams(
            dimension_semantics=("parallel",),
            vmem_limit_bytes=vmem_limit,
        ),
        cost_estimate=cost,
    )(emb2d, pos2d, w1a, w1b, b1, w2, b2)

    # out[i, j] is the result for flattened row i*tb + j; rows >= B (ragged
    # last tile) are garbage and are discarded here.
    return out.reshape((num_tiles * tb,))[:B].reshape(lead_shape + (1,))


def init_params(key, d_e, d_p, hidden_size, dtype=jnp.float32):
    """Matches torch.nn.Linear default init (uniform +-1/sqrt(fan_in)); W1^T
    is stored split into the rows that multiply `embeddings` and `positive`."""
    input_size = d_e + d_p
    k1, k2, k3, k4 = jax.random.split(key, 4)
    bound1 = 1.0 / jnp.sqrt(jnp.float32(input_size))
    bound2 = 1.0 / jnp.sqrt(jnp.float32(hidden_size))
    w1 = jax.random.uniform(k1, (hidden_size, input_size), jnp.float32, -bound1, bound1)
    b1 = jax.random.uniform(k2, (hidden_size,), jnp.float32, -bound1, bound1)
    w2 = jax.random.uniform(k3, (1, hidden_size), jnp.float32, -bound2, bound2)
    b2 = jax.random.uniform(k4, (1,), jnp.float32, -bound2, bound2)
    w1t = w1.T  # [input_size, hidden]
    return {
        "w1a": w1t[:d_e].astype(dtype),                  # [d_e, hidden]
        "w1b": w1t[d_e:].astype(dtype),                  # [d_p, hidden]
        "b1": b1.reshape(1, hidden_size).astype(dtype),  # [1, hidden]
        "w2": w2.astype(dtype),                          # [1, hidden]
        "b2": b2.reshape(1, 1).astype(dtype),            # [1, 1]
    }


if __name__ == "__main__":
    key = jax.random.PRNGKey(0)
    k_emb, k_pos, k_par, k_emb2, k_pos2 = jax.random.split(key, 5)

    d_e, d_p, hidden_size = 16, 16, 32
    params = init_params(k_par, d_e, d_p, hidden_size)
    w1t = jnp.concatenate([params["w1a"], params["w1b"]], axis=0)

    def reference(emb, pos, cast_bf16):
        if cast_bf16:
            emb = emb.astype(jnp.bfloat16).astype(jnp.float32)
            pos = pos.astype(jnp.bfloat16).astype(jnp.float32)
            w1 = w1t.astype(jnp.bfloat16).astype(jnp.float32)
        else:
            w1 = w1t
        x = jnp.concatenate([emb, pos], axis=-1)
        h = jnp.maximum(x @ w1 + params["b1"], 0.0)
        return h @ params["w2"].T + params["b2"]

    # 1) Tiny batch, exact f32 path (single exact tile, no padding/raggedness).
    N = 8
    emb = jax.random.normal(k_emb, (N, d_e), jnp.float32)
    pos = jax.random.normal(k_pos, (N, d_p), jnp.float32)
    out = jax.block_until_ready(
        discriminator_forward(emb, pos, params, cast_to_bf16=False))
    assert out.shape == (N, 1)
    assert jnp.allclose(out, reference(emb, pos, False), atol=1e-4, rtol=1e-4)

    # 2) Multi-tile grid with a ragged last tile + bf16 activation transfer.
    N2 = 300   # not a multiple of the 128-row tile
    emb2 = jax.random.normal(k_emb2, (N2, d_e), jnp.float32)
    pos2 = jax.random.normal(k_pos2, (N2, d_p), jnp.float32)
    out2 = jax.block_until_ready(
        discriminator_forward(emb2, pos2, params, block_rows=128,
                              cast_to_bf16=True))
    assert out2.shape == (N2, 1)
    assert jnp.allclose(out2, reference(emb2, pos2, True), atol=2e-3, rtol=2e-3)

    print("KERNEL_OK")
</pallas_src>

<mosaic_0001>
module attributes {stable_mosaic.version = 11 : i64} {
  func.func @_discriminator_kernel(%arg0: i32, %arg1: memref<8x16xf32, #tpu.memory_space<vmem>>, %arg2: memref<8x16xf32, #tpu.memory_space<vmem>>, %arg3: memref<16x32xf32, #tpu.memory_space<vmem>>, %arg4: memref<16x32xf32, #tpu.memory_space<vmem>>, %arg5: memref<1x32xf32, #tpu.memory_space<vmem>>, %arg6: memref<1x32xf32, #tpu.memory_space<vmem>>, %arg7: memref<1x1xf32, #tpu.memory_space<vmem>>, %arg8: memref<1x8xf32, #tpu.memory_space<vmem>>) attributes {dimension_semantics = [#tpu.dimension_semantics<parallel>], iteration_bounds = array<i64: 1>, scalar_prefetch = 0 : i64, scratch_operands = 0 : i64, tpu.core_type = #tpu.core_type<tc>, window_params = [{transform_indices = @transform_0, window_bounds = array<i64: 8, 16>}, {transform_indices = @transform_1, window_bounds = array<i64: 8, 16>}, {pipeline_mode = #tpu.pipeline_mode<synchronous>, transform_indices = @transform_2, window_bounds = array<i64: 16, 32>}, {pipeline_mode = #tpu.pipeline_mode<synchronous>, transform_indices = @transform_3, window_bounds = array<i64: 16, 32>}, {pipeline_mode = #tpu.pipeline_mode<synchronous>, transform_indices = @transform_4, window_bounds = array<i64: 1, 32>}, {pipeline_mode = #tpu.pipeline_mode<synchronous>, transform_indices = @transform_5, window_bounds = array<i64: 1, 32>}, {pipeline_mode = #tpu.pipeline_mode<synchronous>, transform_indices = @transform_6, window_bounds = array<i64: 1, 1>}, {transform_indices = @transform_7, window_bounds = array<i64: 1, 8>}]} {
    %c0 = arith.constant 0 : index
    %c0_0 = arith.constant 0 : index
    %0 = vector.load %arg1[%c0, %c0_0] : memref<8x16xf32, #tpu.memory_space<vmem>>, vector<8x16xf32>
    %c0_1 = arith.constant 0 : index
    %c0_2 = arith.constant 0 : index
    %1 = vector.load %arg3[%c0_1, %c0_2] : memref<16x32xf32, #tpu.memory_space<vmem>>, vector<16x32xf32>
    %cst = arith.constant dense<0.000000e+00> : vector<8x32xf32>
    %2 = tpu.matmul %0, %1, %cst {dimension_numbers = #tpu.dot_dimension_numbers<[1], [0], [0], [1], [0, 0, 1, 1], [], []>} : vector<8x16xf32>, vector<16x32xf32>, vector<8x32xf32> -> vector<8x32xf32>
    %c0_3 = arith.constant 0 : index
    %c0_4 = arith.constant 0 : index
    %3 = vector.load %arg2[%c0_3, %c0_4] : memref<8x16xf32, #tpu.memory_space<vmem>>, vector<8x16xf32>
    %c0_5 = arith.constant 0 : index
    %c0_6 = arith.constant 0 : index
    %4 = vector.load %arg4[%c0_5, %c0_6] : memref<16x32xf32, #tpu.memory_space<vmem>>, vector<16x32xf32>
    %cst_7 = arith.constant dense<0.000000e+00> : vector<8x32xf32>
    %5 = tpu.matmul %3, %4, %cst_7 {dimension_numbers = #tpu.dot_dimension_numbers<[1], [0], [0], [1], [0, 0, 1, 1], [], []>} : vector<8x16xf32>, vector<16x32xf32>, vector<8x32xf32> -> vector<8x32xf32>
    %6 = arith.addf %2, %5 : vector<8x32xf32>
    %c0_8 = arith.constant 0 : index
    %c0_9 = arith.constant 0 : index
    %7 = vector.load %arg5[%c0_8, %c0_9] : memref<1x32xf32, #tpu.memory_space<vmem>>, vector<1x32xf32>
    %8 = vector.broadcast %7 : vector<1x32xf32> to vector<8x32xf32>
    %9 = arith.addf %6, %8 : vector<8x32xf32>
    %cst_10 = arith.constant 0.000000e+00 : f32
    %10 = vector.broadcast %cst_10 : f32 to vector<8x32xf32>
    %11 = arith.maximumf %9, %10 : vector<8x32xf32>
    %c0_11 = arith.constant 0 : index
    %c0_12 = arith.constant 0 : index
    %12 = vector.load %arg6[%c0_11, %c0_12] : memref<1x32xf32, #tpu.memory_space<vmem>>, vector<1x32xf32>
    %cst_13 = arith.constant dense<0.000000e+00> : vector<1x8xf32>
    %13 = tpu.matmul %12, %11, %cst_13 {dimension_numbers = #tpu.dot_dimension_numbers<[1], [1], [0], [0], [0, 0, 1, 0], [], []>} : vector<1x32xf32>, vector<8x32xf32>, vector<1x8xf32> -> vector<1x8xf32>
    %c0_14 = arith.constant 0 : index
    %c0_15 = arith.constant 0 : index
    %14 = vector.load %arg7[%c0_14, %c0_15] : memref<1x1xf32, #tpu.memory_space<vmem>>, vector<1x1xf32>
    %15 = vector.broadcast %14 : vector<1x1xf32> to vector<1x8xf32>
    %16 = arith.addf %13, %15 : vector<1x8xf32>
    %c0_16 = arith.constant 0 : index
    %c0_17 = arith.constant 0 : index
    %17 = vector.load %arg8[%c0_16, %c0_17] : memref<1x8xf32, #tpu.memory_space<vmem>>, vector<1x8xf32>
    tpu.vector_store %arg8[%c0_16, %c0_17], %16 {strides = array<i32>} : memref<1x8xf32, #tpu.memory_space<vmem>>, vector<1x8xf32>,
    return
  }
  func.func @transform_0(%arg0: i32) -> (i32, i32) {
    %c0_i32 = arith.constant 0 : i32
    %c0_i32_0 = arith.constant 0 : i32
    return %arg0, %c0_i32 : i32, i32
  }
  func.func @transform_1(%arg0: i32) -> (i32, i32) {
    %c0_i32 = arith.constant 0 : i32
    %c0_i32_0 = arith.constant 0 : i32
    return %arg0, %c0_i32 : i32, i32
  }
  func.func @transform_2(%arg0: i32) -> (i32, i32) {
    %c0_i32 = arith.constant 0 : i32
    %c0_i32_0 = arith.constant 0 : i32
    %c0_i32_1 = arith.constant 0 : i32
    return %c0_i32, %c0_i32_0 : i32, i32
  }
  func.func @transform_3(%arg0: i32) -> (i32, i32) {
    %c0_i32 = arith.constant 0 : i32
    %c0_i32_0 = arith.constant 0 : i32
    %c0_i32_1 = arith.constant 0 : i32
    return %c0_i32, %c0_i32_0 : i32, i32
  }
  func.func @transform_4(%arg0: i32) -> (i32, i32) {
    %c0_i32 = arith.constant 0 : i32
    %c0_i32_0 = arith.constant 0 : i32
    %c0_i32_1 = arith.constant 0 : i32
    return %c0_i32, %c0_i32_0 : i32, i32
  }
  func.func @transform_5(%arg0: i32) -> (i32, i32) {
    %c0_i32 = arith.constant 0 : i32
    %c0_i32_0 = arith.constant 0 : i32
    %c0_i32_1 = arith.constant 0 : i32
    return %c0_i32, %c0_i32_0 : i32, i32
  }
  func.func @transform_6(%arg0: i32) -> (i32, i32) {
    %c0_i32 = arith.constant 0 : i32
    %c0_i32_0 = arith.constant 0 : i32
    %c0_i32_1 = arith.constant 0 : i32
    return %c0_i32, %c0_i32_0 : i32, i32
  }
  func.func @transform_7(%arg0: i32) -> (i32, i32) {
    %c0_i32 = arith.constant 0 : i32
    %c0_i32_0 = arith.constant 0 : i32
    return %arg0, %c0_i32 : i32, i32
  }
}

</mosaic_0001>

<bundles_post_ra>
// kernel: tpu_custom_call.1
= control target key start
LH: loop header
LB: loop body
LE: loop exit
PB: predicated region body
PF: predicated region fallthrough
CT: control target
= control target key end

     0   :  { %s417_s0 = inlined_call_operand.hbm [shape: f32[8,16], index: 0, kind: input, shape index: {}]   ;;  %s418_s1 = inlined_call_operand.hbm [shape: f32[8,16], index: 1, kind: input, shape index: {}]   ;;  %s419_s2 = inlined_call_operand.hbm [shape: f32[16,32], index: 2, kind: input, shape index: {}]   ;;  %s420_s3 = inlined_call_operand.hbm [shape: f32[16,32], index: 3, kind: input, shape index: {}]   ;;  %s421_s4 = inlined_call_operand.vmem [shape: f32[1,32], index: 4, kind: input, shape index: {}]   ;;  %s422_s5 = inlined_call_operand.vmem [shape: f32[1,32], index: 5, kind: input, shape index: {}]   ;;  %s423_s6 = inlined_call_operand.<no memory space> [shape: f32[1,1], index: 6, kind: input, shape index: {}]   ;;  %s424_s7 = inlined_call_operand.hbm [shape: f32[1,8], index: 7, kind: output, shape index: {}]  }
   0x1   :  { %v12_v0 = vstv %s423_s6 }
   0x2   :  { %13 = vst [vmem:[#allocation2] sm:$0x1] %v12_v0 }
   0x3   :  { %14 = vsyncpa [#allocation4], 0 }
   0x4   :  { %15 = vsyncpa [#allocation7], 0 }
   0x5   :  { %16 = vsyncpa [#allocation10], 0  ;;  %s34_s28 = sshll.u32 %s418_s1, 4  ;;  %s35_s28 = int_to_ptr.hbm [resolvable:$true] %s34_s28 }
   0x6   :  { %17 = vsyncpa [#allocation5], 0  ;;  %s345_s29 = smov [#allocation6]   ;;  %s23_s10 = sshll.u32 %s417_s0, 4  ;;  %s24_s10 = int_to_ptr.hbm [resolvable:$true] %s23_s10 }
   0x7   :  { %s36_s30 = sshll.u32 %s345_s29, 4  ;;  %s346_s6 = smov [#allocation3]   ;;  %s37_s30 = int_to_ptr.vmem [resolvable:$true] %s36_s30 }
   0x8   :  { %39 = dma.hbm_to_vmem [thread:$0]  %s35_s28, 128, %s37_s30, [#allocation7]  }
   0x9   :  { %s25_s11 = sshll.u32 %s346_s6, 4  ;;  %s44_s14 = sshll.u32 %s419_s2, 4  ;;  %s26_s11 = int_to_ptr.vmem [resolvable:$true] %s25_s11  ;;  %s45_s14 = int_to_ptr.hbm [resolvable:$true] %s44_s14 }
   0xa   :  { %28 = dma.hbm_to_vmem [thread:$0]  %s24_s10, 128, %s26_s11, [#allocation4]  }
   0xb   :  { %s347_s1 = smov [#allocation8]   ;;  %s57_s18 = sshll.u32 %s420_s3, 4  ;;  %s58_s18 = int_to_ptr.hbm [resolvable:$true] %s57_s18 }
   0xc   :  { %s46_s15 = sshll.u32 %s347_s1, 4  ;;  %s348_s19 = smov 128   ;;  %s47_s15 = int_to_ptr.vmem [resolvable:$true] %s46_s15 }
   0xd   :  { %s349_s0 = smov 8   ;;  %s350_s20 = smov [#allocation9]  }
   0xe   :  { %52 = dma.hbm_to_vmem [thread:$0]  %s45_s14, 256, %s47_s15, [#allocation7], %s348_s19, %s348_s19, %s349_s0  }
   0xf   :  { %s59_s21 = sshll.u32 %s350_s20, 4  ;;  %s60_s21 = int_to_ptr.vmem [resolvable:$true] %s59_s21 }
  0x10   :  { %65 = dma.hbm_to_vmem [thread:$0]  %s58_s18, 256, %s60_s21, [#allocation10], %s348_s19, %s348_s19, %s349_s0  }
  0x11   :  { %337 = dma.done.wait [#allocation4], 128  }
  0x12   :  { %338 = vsyncadd [#allocation4], 4294967168 }
  0x13   :  { %339 = dma.done.wait [#allocation7], 384  }
  0x14   :  { %340 = vsyncadd [#allocation7], 4294966912 }
  0x15   :  { %341 = dma.done.wait [#allocation10], 256  }
  0x16   :  { %342 = vsyncadd [#allocation10], 4294967040  ;;  %v93_v1 = vld [vmem:[#allocation9 + $0x8] sm:$0xff]  ;;  %v90_v2 = vld [vmem:[#allocation8 + $0x8] sm:$0xff]  ;;  %vm94_vm0 = vcmask 130048   ;;  %v351_v8 = vmov 0  }
  0x17   :  { %v92_v3 = vld [vmem:[#allocation9] sm:$0xff]  ;;  %112 = vmatpush.msra.mxu0 %v93_v1  ;;  %135 = vmatpush.msra.mxu1 %v90_v2  ;;  %v89_v4 = vld [vmem:[#allocation8] sm:$0xff]  ;;  %v91_v5 = vld [vmem:[#allocation6] sm:$0xff]  ;;  %vm155_vm1 = vcmask 261120   ;;  %s352_s24 = smov [#allocation11]   ;;  %vm182_vm2 = vcmask 57344  }
  0x18   :  { %v88_v6 = vld [vmem:[#allocation3] sm:$0xff]  ;;  %v148_v7 = vld [vmem:[#allocation2] sm:$0x1]  ;;  %215 = vset.pattern.permute.xlu0 %v351_v8  ;;  %s189_s25 = sshll.u32 %s352_s24, 4  ;;  %s190_s25 = int_to_ptr.vmem [resolvable:$true] %s189_s25 }
  0x19   :  { %113 = vmatpush.msra.mxu0 %v92_v3  ;;  %136 = vmatpush.msra.mxu1 %v89_v4  ;;  %v216_v9 = vld [vmem:[%s421_s4] ss:$0 sm:$0xff]  ;;  %s191_s4 = sshll.u32 %s424_s7, 4  ;;  %s192_s4 = int_to_ptr.hbm [resolvable:$true] %s191_s4 }
  0x1a   :  { %203 = vmatmul.msk.f32.vlgmr.msra.gmra.mxu0 %vm94_vm0, %v91_v5  ;;  %204 = vmatmul.msk.f32.vlgmr.msra.gmra.mxu1 %vm94_vm0, %v88_v6  ;;  %v147_v15 = vld [vmem:[%s422_s5] sm:$0x1] }
  0x1b   :  { %151 = vperm.xlu0 %215, %v148_v7  }
  0x8d   :  { %v152_v16 = vpop.permute.xlu0 %151 }
  0x8e   :  { %v154_v17 = vperm.slane %v152_v16, 0 }
  0x97   :  { %v115_v10 = vpop.f32.mrf.mxu0  ;;  %v138_v11 = vpop.f32.mrf.mxu1 }
  0x98   :  { %v139_v12 = vadd.f32 %v138_v11, %v115_v10 }
  0x9a   :  { %v145_v13 = vadd.f32 %v216_v9, %v139_v12 }
  0x9c   :  { %v146_v14 = vmax.f32 %v145_v13, 0.0 }
  0x9e   :  { %205 = vmatpush.xpose.msk.msra.mxu2 %vm155_vm1, %v146_v14 }
  0xa1   :  { %206 = vmatmul.msk.f32.vlgmr.msra.gmra.mxu2 %vm155_vm1, %v147_v15 }
 0x124   :  { %v179_v18 = vpop.f32.mrf.mxu2 }
 0x125   :  { %v180_v19 = vadd.f32 %v179_v18, %v154_v17 }
 0x127   :  { %183 = vst.msk [vmem:[#allocation11] sm:$0x1] %vm182_vm2, %v180_v19 }
 0x128   :  { %194 = dma.vmem_to_hbm [thread:$0]  %s190_s25, 16, %s192_s4, [#allocation5]  }
 0x129   :  { %343 = dma.done.wait [#allocation5], 16  }
 0x12a   :  { %344 = vsyncadd [#allocation5], 4294967280 }
 0x12b   :  { %199 = vsyncpa [#allocation4], 1 }
 0x12c   :  { %200 = vsyncpa [#allocation7], 1 }
 0x12d   :  { %201 = vsyncpa [#allocation10], 1 }
 0x12e   :  { %202 = vsyncpa [#allocation5], 1 }

</bundles_post_ra>
